<compile_context>
chip_gen: v5e
topology: v5e:2x2
jax: 0.10.0
libtpu: 0.0.40
codegen_flags: <defaults>
</compile_context>

<pallas_src>
import functools
import math

import jax
import jax.numpy as jnp
from jax.experimental import pallas as pl
from jax.experimental.pallas import tpu as pltpu

HIDDEN = 768          # fixed by nn.Linear(768, 15)
TAGSET = 15           # fixed by nn.Linear(768, 15)
TAGSET_PAD = 128      # lane-dense classifier output slab
N_HEADS = 12
HEAD_DIM = HIDDEN // N_HEADS
FFN_DIM = 1024
N_LAYERS = 2
VOCAB = 128
MAX_POS = 64
LN_EPS = 1e-12


def _round_up(x, m):
    return (x + m - 1) // m * m


def _layer_norm_f32(x, gamma, beta, eps):
    mu = jnp.mean(x, axis=-1, keepdims=True)
    var = jnp.mean((x - mu) ** 2, axis=-1, keepdims=True)
    return (x - mu) * jax.lax.rsqrt(var + eps) * gamma + beta


# ----------------------------- Pallas kernels -----------------------------

def _embed_kernel(ids_ref, wemb_ref, pemb_ref, g_ref, b_ref, o_ref, *, eps):
    """word_emb gather (exact one-hot matmul) + pos_emb + LayerNorm, per batch elem."""
    S = pemb_ref.shape[0]
    vocab = wemb_ref.shape[0]
    ids = ids_ref[0]                                               # (S, 1) int32
    vocab_iota = jax.lax.broadcasted_iota(jnp.int32, (S, vocab), 1)
    onehot = (ids == vocab_iota).astype(jnp.bfloat16)              # (S, V), exact 0/1
    word = jnp.dot(onehot, wemb_ref[...], preferred_element_type=jnp.float32)
    x = word + pemb_ref[...].astype(jnp.float32)
    o_ref[0] = _layer_norm_f32(x, g_ref[...], b_ref[...], eps).astype(o_ref.dtype)


def _attn_block_kernel(x_ref, qkvw_ref, qkvb_ref, ow_ref, ob_ref, g_ref, b_ref,
                       mbias_ref, o_ref, ctx_ref, *, scale, eps):
    """Fused: QKV projection -> 12-head attention -> out projection -> +res -> LN1.

    x_ref   : (1, S, H) bf16          qkvw/ow : bf16 weights, grid-constant
    mbias   : (1, 1, S) f32 additive mask bias      ctx_ref : (S, H) f32 VMEM scratch
    """
    x = x_ref[0]                                                   # (S, H) bf16
    qkv = jnp.dot(x, qkvw_ref[...],
                  preferred_element_type=jnp.float32) + qkvb_ref[...]   # (S, 3H) f32
    mb = mbias_ref[0]                                              # (1, S), bcast over rows

    for h in range(N_HEADS):
        lo = h * HEAD_DIM
        # scale folded into the (S, 64) Q slice, not the (S, S) score matrix
        qh = (qkv[:, lo:lo + HEAD_DIM] * scale).astype(jnp.bfloat16)
        kh = qkv[:, HIDDEN + lo:HIDDEN + lo + HEAD_DIM].astype(jnp.bfloat16)
        vh = qkv[:, 2 * HIDDEN + lo:2 * HIDDEN + lo + HEAD_DIM].astype(jnp.bfloat16)

        # Q @ K^T without materializing kh.T (contract dim 1 of both operands)
        s = jax.lax.dot_general(qh, kh, (((1,), (1,)), ((), ())),
                                preferred_element_type=jnp.float32)
        s = s + mb                                                 # (S, S)
        m = jnp.max(s, axis=-1, keepdims=True)
        p = jnp.exp(s - m)
        denom = jnp.sum(p, axis=-1, keepdims=True)
        p = p * pl.reciprocal(denom, approx=True)                  # EUP slot, ~free
        ctx_ref[:, lo:lo + HEAD_DIM] = jnp.dot(
            p.astype(jnp.bfloat16), vh, preferred_element_type=jnp.float32)

    ctx = ctx_ref[...].astype(jnp.bfloat16)                        # (S, H)
    attn = jnp.dot(ctx, ow_ref[...],
                   preferred_element_type=jnp.float32) + ob_ref[...]
    y = _layer_norm_f32(attn + x.astype(jnp.float32), g_ref[...], b_ref[...], eps)
    o_ref[0] = y.astype(o_ref.dtype)


def _ffn_kernel(x_ref, w1_ref, b1_ref, w2_ref, b2_ref, g_ref, beta_ref, *rest,
                eps, with_classifier):
    """Fused FFN: x@W1+b1 -> GELU -> @W2+b2 -> +residual -> LN2 [-> classifier]."""
    if with_classifier:
        cw_ref, cb_ref, o_ref, feat_ref = rest
    else:
        (o_ref,) = rest

    x = x_ref[...]                                                 # (tm, H) bf16
    mid = jnp.dot(x, w1_ref[...],
                  preferred_element_type=jnp.float32) + b1_ref[...]      # (tm, FFN) f32
    mid = jax.nn.gelu(mid, approximate=True).astype(jnp.bfloat16)        # stays in VMEM
    out = jnp.dot(mid, w2_ref[...],
                  preferred_element_type=jnp.float32) + b2_ref[...]      # (tm, H) f32
    y = _layer_norm_f32(out + x.astype(jnp.float32), g_ref[...], beta_ref[...], eps)
    o_ref[...] = y.astype(o_ref.dtype)

    if with_classifier:
        # self.linear = nn.Linear(768, 15); weight zero-padded to 128 lanes.
        feat_ref[...] = (jnp.dot(y.astype(jnp.bfloat16), cw_ref[...],
                                 preferred_element_type=jnp.float32)
                         + cb_ref[...]).astype(feat_ref.dtype)


# ----------------------------- wrappers -----------------------------

def embed(sentence, word_emb, pos_emb, gamma, beta, eps=LN_EPS):
    B, S = sentence.shape
    ids = sentence.reshape(B, S, 1).astype(jnp.int32)
    return pl.pallas_call(
        functools.partial(_embed_kernel, eps=eps),
        out_shape=jax.ShapeDtypeStruct((B, S, HIDDEN), jnp.bfloat16),
        grid=(B,),
        in_specs=[
            pl.BlockSpec((1, S, 1), lambda b: (b, 0, 0)),
            pl.BlockSpec((VOCAB, HIDDEN), lambda b: (0, 0)),
            pl.BlockSpec((S, HIDDEN), lambda b: (0, 0)),
            pl.BlockSpec((1, HIDDEN), lambda b: (0, 0)),
            pl.BlockSpec((1, HIDDEN), lambda b: (0, 0)),
        ],
        out_specs=pl.BlockSpec((1, S, HIDDEN), lambda b: (b, 0, 0)),
        compiler_params=pltpu.CompilerParams(dimension_semantics=("parallel",)),
    )(ids, word_emb, pos_emb[:S], gamma.reshape(1, HIDDEN), beta.reshape(1, HIDDEN))


def attention_block(h, lp, mask_bias, eps=LN_EPS):
    B, S, H = h.shape
    scale = 1.0 / math.sqrt(HEAD_DIM)
    return pl.pallas_call(
        functools.partial(_attn_block_kernel, scale=scale, eps=eps),
        out_shape=jax.ShapeDtypeStruct((B, S, H), h.dtype),
        grid=(B,),
        in_specs=[
            pl.BlockSpec((1, S, H), lambda b: (b, 0, 0)),
            pl.BlockSpec((H, 3 * H), lambda b: (0, 0)),
            pl.BlockSpec((1, 3 * H), lambda b: (0, 0)),
            pl.BlockSpec((H, H), lambda b: (0, 0)),
            pl.BlockSpec((1, H), lambda b: (0, 0)),
            pl.BlockSpec((1, H), lambda b: (0, 0)),
            pl.BlockSpec((1, H), lambda b: (0, 0)),
            pl.BlockSpec((1, 1, S), lambda b: (b, 0, 0)),
        ],
        out_specs=pl.BlockSpec((1, S, H), lambda b: (b, 0, 0)),
        scratch_shapes=[pltpu.VMEM((S, H), jnp.float32)],
        compiler_params=pltpu.CompilerParams(dimension_semantics=("parallel",)),
    )(h, lp["qkv_w"], lp["qkv_b"].reshape(1, 3 * H),
      lp["out_w"], lp["out_b"].reshape(1, H),
      lp["ln1"][0].reshape(1, H), lp["ln1"][1].reshape(1, H), mask_bias)


def ffn_block(x2, lp, cls_w=None, cls_b=None, eps=LN_EPS):
    """(M, H) bf16 -> (M, H) bf16 hidden (and (M, 128) f32 feats on the last layer)."""
    M, H = x2.shape
    with_classifier = cls_w is not None

    tm = min(256, _round_up(M, 8))
    if M > 8 and _round_up(M, tm) == tm:
        # single grid step -> split so both v7x TensorCores get a parallel step
        tm = _round_up((M + 1) // 2, 8)
    Mp = _round_up(M, tm)
    if Mp != M:
        x2 = jnp.pad(x2, ((0, Mp - M), (0, 0)))

    in_specs = [
        pl.BlockSpec((tm, H), lambda i: (i, 0)),
        pl.BlockSpec((H, FFN_DIM), lambda i: (0, 0)),
        pl.BlockSpec((1, FFN_DIM), lambda i: (0, 0)),
        pl.BlockSpec((FFN_DIM, H), lambda i: (0, 0)),
        pl.BlockSpec((1, H), lambda i: (0, 0)),
        pl.BlockSpec((1, H), lambda i: (0, 0)),
        pl.BlockSpec((1, H), lambda i: (0, 0)),
    ]
    operands = [x2, lp["ffn_w1"], lp["ffn_b1"].reshape(1, FFN_DIM),
                lp["ffn_w2"], lp["ffn_b2"].reshape(1, H),
                lp["ln2"][0].reshape(1, H), lp["ln2"][1].reshape(1, H)]

    if with_classifier:
        in_specs += [pl.BlockSpec((H, TAGSET_PAD), lambda i: (0, 0)),
                     pl.BlockSpec((1, TAGSET_PAD), lambda i: (0, 0))]
        operands += [cls_w, cls_b.reshape(1, TAGSET_PAD)]
        out_shape = (jax.ShapeDtypeStruct((Mp, H), x2.dtype),
                     jax.ShapeDtypeStruct((Mp, TAGSET_PAD), jnp.float32))
        out_specs = (pl.BlockSpec((tm, H), lambda i: (i, 0)),
                     pl.BlockSpec((tm, TAGSET_PAD), lambda i: (i, 0)))
    else:
        out_shape = jax.ShapeDtypeStruct((Mp, H), x2.dtype)
        out_specs = pl.BlockSpec((tm, H), lambda i: (i, 0))

    result = pl.pallas_call(
        functools.partial(_ffn_kernel, eps=eps, with_classifier=with_classifier),
        out_shape=out_shape,
        grid=(Mp // tm,),
        in_specs=in_specs,
        out_specs=out_specs,
        compiler_params=pltpu.CompilerParams(dimension_semantics=("parallel",)),
    )(*operands)

    if with_classifier:
        h_out, feats = result
        return (h_out[:M] if Mp != M else h_out), (feats[:M] if Mp != M else feats)
    h_out = result
    return (h_out[:M] if Mp != M else h_out), None


# ----------------------------- parameters -----------------------------

def init_params(key):
    def dense(k, din, dout):
        w = (0.02 * jax.random.normal(k, (din, dout), jnp.float32)).astype(jnp.bfloat16)
        return w, jnp.zeros((dout,), jnp.float32)   # f32 bias, added on f32 accumulator

    keys = jax.random.split(key, 3 + 4 * N_LAYERS)
    params = {
        "word_emb": (0.02 * jax.random.normal(keys[0], (VOCAB, HIDDEN), jnp.float32)
                     ).astype(jnp.bfloat16),
        "pos_emb": (0.02 * jax.random.normal(keys[1], (MAX_POS, HIDDEN), jnp.float32)
                    ).astype(jnp.bfloat16),
        "emb_ln": (jnp.ones((HIDDEN,), jnp.float32), jnp.zeros((HIDDEN,), jnp.float32)),
        "layers": [],
    }
    for l in range(N_LAYERS):
        k0, k1, k2, k3 = keys[2 + 4 * l: 6 + 4 * l]
        qkv_w, qkv_b = dense(k0, HIDDEN, 3 * HIDDEN)
        out_w, out_b = dense(k1, HIDDEN, HIDDEN)
        f1_w, f1_b = dense(k2, HIDDEN, FFN_DIM)
        f2_w, f2_b = dense(k3, FFN_DIM, HIDDEN)
        params["layers"].append({
            "qkv_w": qkv_w, "qkv_b": qkv_b,
            "out_w": out_w, "out_b": out_b,
            "ffn_w1": f1_w, "ffn_b1": f1_b,
            "ffn_w2": f2_w, "ffn_b2": f2_b,
            "ln1": (jnp.ones((HIDDEN,), jnp.float32), jnp.zeros((HIDDEN,), jnp.float32)),
            "ln2": (jnp.ones((HIDDEN,), jnp.float32), jnp.zeros((HIDDEN,), jnp.float32)),
        })
    # self.linear = nn.Linear(768, 15); zero-pad to 128 columns for lane-dense stores.
    cls_w, cls_b = dense(keys[-1], HIDDEN, TAGSET)
    params["cls_w_pad"] = jnp.zeros((HIDDEN, TAGSET_PAD), jnp.bfloat16).at[:, :TAGSET].set(cls_w)
    params["cls_b_pad"] = jnp.zeros((TAGSET_PAD,), jnp.float32).at[:TAGSET].set(cls_b)
    return params


# ----------------------------- forward -----------------------------

def ernie_crf_forward(params, sentence, attention_mask=None):
    """sentence: (B, S) int32 token ids -> feat: (B, S, 15) float32."""
    B, S = sentence.shape
    if attention_mask is None:
        attention_mask = jnp.ones((B, S), jnp.float32)

    # additive mask bias kept at (B, 1, S); broadcast inside the attention kernel
    mask_bias = ((1.0 - attention_mask.astype(jnp.float32)) * -1e9)[:, None, :]

    # embeddings: gather + positional add + LayerNorm, fully in-kernel
    h = embed(sentence, params["word_emb"], params["pos_emb"], *params["emb_ln"])

    feats = None
    n_layers = len(params["layers"])
    for li, lp in enumerate(params["layers"]):
        h = attention_block(h, lp, mask_bias)                      # (B, S, H) bf16
        x2 = h.reshape(B * S, HIDDEN)
        if li == n_layers - 1:
            # classifier fused as the epilogue of the final FFN/LN kernel
            h2, feats = ffn_block(x2, lp, cls_w=params["cls_w_pad"],
                                  cls_b=params["cls_b_pad"])
        else:
            h2, _ = ffn_block(x2, lp)
        h = h2.reshape(B, S, HIDDEN)

    # self.dropout1 is identity at inference (model.eval()).
    return feats.reshape(B, S, TAGSET_PAD)[:, :, :TAGSET]


# ----------------------------- main -----------------------------

if __name__ == "__main__":
    key = jax.random.PRNGKey(0)
    pkey, skey = jax.random.split(key)
    params = init_params(pkey)

    B, S = 2, 8
    sentence = jax.random.randint(skey, (B, S), 0, VOCAB, dtype=jnp.int32)
    attention_mask = jnp.ones((B, S), jnp.float32)

    feats = ernie_crf_forward(params, sentence, attention_mask)
    feats = jax.block_until_ready(feats)

    assert feats.shape == (B, S, TAGSET), feats.shape
    assert feats.dtype == jnp.float32
    assert bool(jnp.all(jnp.isfinite(feats)))
    print("KERNEL_OK")
</pallas_src>

<mosaic_0001>
module attributes {stable_mosaic.version = 11 : i64} {
  func.func @_embed_kernel(%arg0: i32, %arg1: memref<1x8x1xi32, #tpu.memory_space<vmem>>, %arg2: memref<128x768xbf16, #tpu.memory_space<vmem>>, %arg3: memref<8x768xbf16, #tpu.memory_space<vmem>>, %arg4: memref<1x768xf32, #tpu.memory_space<vmem>>, %arg5: memref<1x768xf32, #tpu.memory_space<vmem>>, %arg6: memref<1x8x768xbf16, #tpu.memory_space<vmem>>) attributes {dimension_semantics = [#tpu.dimension_semantics<parallel>], iteration_bounds = array<i64: 2>, scalar_prefetch = 0 : i64, scratch_operands = 0 : i64, tpu.core_type = #tpu.core_type<tc>, window_params = [{transform_indices = @transform_0, window_bounds = array<i64: 1, 8, 1>}, {pipeline_mode = #tpu.pipeline_mode<synchronous>, transform_indices = @transform_1, window_bounds = array<i64: 128, 768>}, {pipeline_mode = #tpu.pipeline_mode<synchronous>, transform_indices = @transform_2, window_bounds = array<i64: 8, 768>}, {pipeline_mode = #tpu.pipeline_mode<synchronous>, transform_indices = @transform_3, window_bounds = array<i64: 1, 768>}, {pipeline_mode = #tpu.pipeline_mode<synchronous>, transform_indices = @transform_4, window_bounds = array<i64: 1, 768>}, {transform_indices = @transform_5, window_bounds = array<i64: 1, 8, 768>}]} {
    %c0 = arith.constant 0 : index
    %c0_0 = arith.constant 0 : index
    %c0_1 = arith.constant 0 : index
    %0 = vector.load %arg1[%c0, %c0_0, %c0_1] : memref<1x8x1xi32, #tpu.memory_space<vmem>>, vector<1x8x1xi32>
    %1 = vector.shape_cast %0 : vector<1x8x1xi32> to vector<8x1xi32>
    %2 = tpu.iota {dimensions = array<i32: 1>} : vector<8x128xi32>
    %3 = vector.broadcast %1 : vector<8x1xi32> to vector<8x128xi32>
    %4 = arith.cmpi eq, %3, %2 : vector<8x128xi32>
    %5 = arith.extui %4 : vector<8x128xi1> to vector<8x128xi32>
    %6 = arith.sitofp %5 : vector<8x128xi32> to vector<8x128xf32>
    %7 = arith.truncf %6 : vector<8x128xf32> to vector<8x128xbf16>
    %c0_2 = arith.constant 0 : index
    %c0_3 = arith.constant 0 : index
    %8 = vector.load %arg2[%c0_2, %c0_3] : memref<128x768xbf16, #tpu.memory_space<vmem>>, vector<128x768xbf16>
    %cst = arith.constant dense<0.000000e+00> : vector<8x768xf32>
    %9 = tpu.matmul %7, %8, %cst {dimension_numbers = #tpu.dot_dimension_numbers<[1], [0], [0], [1], [0, 0, 1, 1], [], []>} : vector<8x128xbf16>, vector<128x768xbf16>, vector<8x768xf32> -> vector<8x768xf32>
    %c0_4 = arith.constant 0 : index
    %c0_5 = arith.constant 0 : index
    %10 = vector.load %arg3[%c0_4, %c0_5] : memref<8x768xbf16, #tpu.memory_space<vmem>>, vector<8x768xbf16>
    %11 = arith.extf %10 : vector<8x768xbf16> to vector<8x768xf32>
    %12 = arith.addf %9, %11 : vector<8x768xf32>
    %c0_6 = arith.constant 0 : index
    %c0_7 = arith.constant 0 : index
    %13 = vector.load %arg4[%c0_6, %c0_7] : memref<1x768xf32, #tpu.memory_space<vmem>>, vector<1x768xf32>
    %c0_8 = arith.constant 0 : index
    %c0_9 = arith.constant 0 : index
    %14 = vector.load %arg5[%c0_8, %c0_9] : memref<1x768xf32, #tpu.memory_space<vmem>>, vector<1x768xf32>
    %cst_10 = arith.constant dense<0.000000e+00> : vector<8xf32>
    %15 = vector.multi_reduction <add>, %12, %cst_10 [1] : vector<8x768xf32> to vector<8xf32>
    %16 = vector.shape_cast %15 : vector<8xf32> to vector<8x1xf32>
    %cst_11 = arith.constant 7.680000e+02 : f32
    %17 = vector.broadcast %cst_11 : f32 to vector<8x1xf32>
    %18 = arith.divf %16, %17 : vector<8x1xf32>
    %19 = vector.broadcast %18 : vector<8x1xf32> to vector<8x768xf32>
    %20 = arith.subf %12, %19 : vector<8x768xf32>
    %21 = arith.mulf %20, %20 : vector<8x768xf32>
    %cst_12 = arith.constant dense<0.000000e+00> : vector<8xf32>
    %22 = vector.multi_reduction <add>, %21, %cst_12 [1] : vector<8x768xf32> to vector<8xf32>
    %23 = vector.shape_cast %22 : vector<8xf32> to vector<8x1xf32>
    %cst_13 = arith.constant 7.680000e+02 : f32
    %24 = vector.broadcast %cst_13 : f32 to vector<8x1xf32>
    %25 = arith.divf %23, %24 : vector<8x1xf32>
    %26 = vector.broadcast %18 : vector<8x1xf32> to vector<8x768xf32>
    %27 = arith.subf %12, %26 : vector<8x768xf32>
    %cst_14 = arith.constant 9.99999996E-13 : f32
    %28 = vector.broadcast %cst_14 : f32 to vector<8x1xf32>
    %29 = arith.addf %25, %28 : vector<8x1xf32>
    %30 = math.rsqrt %29 : vector<8x1xf32>
    %31 = vector.broadcast %30 : vector<8x1xf32> to vector<8x768xf32>
    %32 = arith.mulf %27, %31 : vector<8x768xf32>
    %33 = vector.broadcast %13 : vector<1x768xf32> to vector<8x768xf32>
    %34 = arith.mulf %32, %33 : vector<8x768xf32>
    %35 = vector.broadcast %14 : vector<1x768xf32> to vector<8x768xf32>
    %36 = arith.addf %34, %35 : vector<8x768xf32>
    %37 = arith.truncf %36 : vector<8x768xf32> to vector<8x768xbf16>
    %c0_15 = arith.constant 0 : index
    %c0_16 = arith.constant 0 : index
    %c0_17 = arith.constant 0 : index
    %38 = vector.load %arg6[%c0_15, %c0_16, %c0_17] : memref<1x8x768xbf16, #tpu.memory_space<vmem>>, vector<1x8x768xbf16>
    %39 = vector.shape_cast %38 : vector<1x8x768xbf16> to vector<8x768xbf16>
    %40 = vector.shape_cast %37 : vector<8x768xbf16> to vector<1x8x768xbf16>
    tpu.vector_store %arg6[%c0_15, %c0_16, %c0_17], %40 {strides = array<i32>} : memref<1x8x768xbf16, #tpu.memory_space<vmem>>, vector<1x8x768xbf16>,
    return
  }
  func.func @transform_0(%arg0: i32) -> (i32, i32, i32) {
    %c0_i32 = arith.constant 0 : i32
    %c0_i32_0 = arith.constant 0 : i32
    %c0_i32_1 = arith.constant 0 : i32
    return %arg0, %c0_i32, %c0_i32_0 : i32, i32, i32
  }
  func.func @transform_1(%arg0: i32) -> (i32, i32) {
    %c0_i32 = arith.constant 0 : i32
    %c0_i32_0 = arith.constant 0 : i32
    %c0_i32_1 = arith.constant 0 : i32
    return %c0_i32, %c0_i32_0 : i32, i32
  }
  func.func @transform_2(%arg0: i32) -> (i32, i32) {
    %c0_i32 = arith.constant 0 : i32
    %c0_i32_0 = arith.constant 0 : i32
    %c0_i32_1 = arith.constant 0 : i32
    return %c0_i32, %c0_i32_0 : i32, i32
  }
  func.func @transform_3(%arg0: i32) -> (i32, i32) {
    %c0_i32 = arith.constant 0 : i32
    %c0_i32_0 = arith.constant 0 : i32
    %c0_i32_1 = arith.constant 0 : i32
    return %c0_i32, %c0_i32_0 : i32, i32
  }
  func.func @transform_4(%arg0: i32) -> (i32, i32) {
    %c0_i32 = arith.constant 0 : i32
    %c0_i32_0 = arith.constant 0 : i32
    %c0_i32_1 = arith.constant 0 : i32
    return %c0_i32, %c0_i32_0 : i32, i32
  }
  func.func @transform_5(%arg0: i32) -> (i32, i32, i32) {
    %c0_i32 = arith.constant 0 : i32
    %c0_i32_0 = arith.constant 0 : i32
    %c0_i32_1 = arith.constant 0 : i32
    return %arg0, %c0_i32, %c0_i32_0 : i32, i32, i32
  }
}

</mosaic_0001>

<bundles_post_ra>
// kernel: tpu_custom_call.1
= control target key start
LH: loop header
LB: loop body
LE: loop exit
PB: predicated region body
PF: predicated region fallthrough
CT: control target
= control target key end

     0   :  { %10 = vsyncpa [#allocation3], 0  ;;  %s1462_s0 = inlined_call_operand.vmem [shape: s32[2,8,1], index: 0, kind: input, shape index: {}]   ;;  %s1463_s1 = inlined_call_operand.hbm [shape: bf16[128,768], index: 1, kind: input, shape index: {}]   ;;  %s1464_s2 = inlined_call_operand.hbm [shape: bf16[8,768], index: 2, kind: input, shape index: {}]   ;;  %s1465_s3 = inlined_call_operand.vmem [shape: f32[1,768], index: 3, kind: input, shape index: {}]   ;;  %s1466_s4 = inlined_call_operand.vmem [shape: f32[1,768], index: 4, kind: input, shape index: {}]   ;;  %s1467_s5 = inlined_call_operand.hbm [shape: bf16[2,8,768], index: 5, kind: output, shape index: {}]  }
   0x1   :  { %11 = vsyncpa [#allocation6], 0 }
   0x2   :  { %12 = vsyncpa [#allocation4], 0 }
   0x3   :  { %14 = vsyncpa [#allocation4 + $0x1], 0  ;;  %s1339_s18 = smov 0   ;;  %s1341_s19 = smov 0  }
   0x4   :  { %s1343_s20 = smov 0   ;;  %s1345_s21 = smov 0  }
   0x5 LB: > { %s1360_s22 = sadd.s32 4294967295, %s1300_s21   ;;  %s833_s23 = sadd.s32 4294967294, %s1300_s21   ;;  %s1300_s21 = sphi %s1345_s21, %s1474_s21   ;;  %s1296_s20 = sphi %s1343_s20, %s1473_s20   ;;  %s1292_s19 = sphi %s1341_s19, %s1472_s19   ;;  %s1288_s18 = sphi %s1339_s18, %s1471_s18  }
   0x6   : > { %s1364_s24 = sadd.s32 1, %s1300_s21   ;;  %s137_s25 = sadd.s32 1, %s1296_s20 }
   0x7   : > { %s134_s26 = ssub.s32 %s1300_s21, %s1364_s24  ;;  %p147_p0 = scmp.ne.s32.totalorder %s1296_s20, %s1292_s19 }
   0x8   : > { %p135_p1 = scmp.eq.s32.totalorder %s134_s26, 0  ;;  %p148_p2 = scmp.eq.s32.totalorder %s1360_s22, 1 }
   0x9   : > { %p153_p3 = scmp.ne.s32.totalorder %s1292_s19, %s1288_s18  ;;  %p154_p4 = scmp.eq.s32.totalorder %s833_s23, 1 }
   0xa   : > { %s1375_s27 = scalar_select %p135_p1, %s1296_s20, %s137_s25  }
   0xb   : > { %p1377_p5 = por %p148_p2, %p147_p0  ;;  %p1381_p6 = por %p154_p4, %p153_p3 }
   0xc   : > { %p834_p7 = scmp.ge.s32.totalorder %s1300_s21, 1  ;;  %p161_p8 = scmp.lt.s32.totalorder %s1300_s21, 3 }
   0xd   : > { %p1121_p9 = scmp.eq.s32.totalorder %s1360_s22, 0  ;;  %s172_s8 = sshll.u32 %s1463_s1, 4  ;;  %s173_s8 = int_to_ptr.hbm [resolvable:$true] %s172_s8 }
   0xe   : > { %p1388_p10 = pnand %p834_p7, %p161_p8  ;;  %s1302_s9 = smov [#allocation2]  }
   0xf   : > { %s174_s10 = sshll.u32 %s1302_s9, 4  ;;  %s187_s13 = sshll.u32 %s1464_s2, 4  ;;  %s175_s10 = int_to_ptr.vmem [resolvable:$true] %s174_s10  ;;  %s188_s13 = int_to_ptr.hbm [resolvable:$true] %s187_s13 }
  0x10   : > { %p1110_p11 = pneg %p1388_p10  ;;  %s1303_s14 = smov 384  }
  0x11   : > { %s1304_s15 = smov 24   ;;  %s1305_s16 = smov [#allocation5]  }
  0x12   : > { %p1111_p12 = pnand %p1121_p9, %p1110_p11  ;;  %s189_s17 = sshll.u32 %s1305_s16, 4  ;;  %s190_s17 = int_to_ptr.vmem [resolvable:$true] %s189_s17 }
  0x13   : > { %215 = sbr.rel (%p1388_p10) target bundleno = 582 (0x246), region = 40 }
  0x14   : > { %1113 = dma.hbm_to_vmem [thread:$0]  (!%p1111_p12), %s173_s8, 6144, %s175_s10, [#allocation3], %s1303_s14, %s1303_s14, %s1304_s15  }
  0x15   : > { %1116 = dma.hbm_to_vmem [thread:$0]  (!%p1111_p12), %s188_s13, 384, %s190_s17, [#allocation6]  }
  0x18   : > { %1275 = dma.done.wait (%p1121_p9), [#allocation3], 6144  }
  0x19   : > { %1277 = vsyncadd (%p1121_p9), [#allocation3], 4294961152 }
  0x1a   : > { %1279 = dma.done.wait (%p1121_p9), [#allocation6], 384  }
  0x1b   : > { %1281 = vsyncadd (%p1121_p9), [#allocation6], 4294966912  ;;  %p248_p13 = scmp.lt.s32.totalorder %s1360_s22, 1  ;;  %v1306_v0 = vmov 0   ;;  %v1013_v2 = vld [vmem:[#allocation2 + $0x150] sm:$0xf] }
  0x1c   : > { %1165 = vset.pattern.permute.xlu0 %v1306_v0  ;;  %v1095_v3 = vld [vmem:[#allocation2 + $0x164] sm:$0xf0]  ;;  %v1092_v5 = vld [vmem:[#allocation2 + $0x154] sm:$0xf]  ;;  %v1015_v6 = vld [vmem:[#allocation2 + $0x168] sm:$0xf0] }
  0x1d   : > { %s249_s23 = scalar_select %p248_p13, %s1360_s22, 1  ;;  %v1014_v4 = vor.u32 %v1095_v3, %v1013_v2  ;;  %v989_v7 = vld [vmem:[#allocation2 + $0x120] sm:$0xf]  ;;  %v1018_v8 = vor.u32 %v1092_v5, %v1015_v6  ;;  %v1089_v9 = vld [vmem:[#allocation2 + $0x134] sm:$0xf0] }
  0x1e   : > { %v1086_v10 = vld [vmem:[#allocation2 + $0x124] sm:$0xf]  ;;  %v991_v11 = vld [vmem:[#allocation2 + $0x138] sm:$0xf0]  ;;  %v990_v12 = vor.u32 %v1089_v9, %v989_v7  ;;  %v965_v14 = vld [vmem:[#allocation2 + $0xf0] sm:$0xf] }
  0x1f   : > { %s841_s25 = sshll.u32 %s249_s23, 3  ;;  %559 = vmatpush.bf16.msra.mxu0 %v1014_v4  ;;  %572 = vmatpush.bf16.msra.mxu1 %v1018_v8  ;;  %v994_v13 = vor.u32 %v1086_v10, %v991_v11  ;;  %v1083_v15 = vld [vmem:[#allocation2 + $0x104] sm:$0xf0]  ;;  %v1080_v16 = vld [vmem:[#allocation2 + $0xf4] sm:$0xf]  ;;  %s245_s9 = sand.u32 1, %s1292_s19  }
  0x20   : > { %s251_s6 = scalar_lea.vmem %s1462_s0, %s841_s25  ;;  %v967_v17 = vld [vmem:[#allocation2 + $0x108] sm:$0xf0]  ;;  %v1021_v18 = vld [vmem:[#allocation2 + $0x158] sm:$0xf]  ;;  %v1096_v19 = vld [vmem:[#allocation2 + $0x16c] sm:$0xf0]  ;;  %v966_v22 = vor.u32 %v1083_v15, %v965_v14 }
  0x21   : > { %v252_v1 = vld [vmem:[%s251_s6] sm:$0xff]  ;;  %v1093_v20 = vld [vmem:[#allocation2 + $0x15c] sm:$0xf]  ;;  %v1023_v21 = vld [vmem:[#allocation2 + $0x170] sm:$0xf0]  ;;  %v1022_v25 = vor.u32 %v1096_v19, %v1021_v18  ;;  %v970_v27 = vor.u32 %v1080_v16, %v967_v17  ;;  %s1426_s12 = smul.u32 24, %s245_s9 }
  0x22   : > { %256 = vperm.xlu0 %1165, %v252_v1   ;;  %v941_v23 = vld [vmem:[#allocation2 + $0xc0] sm:$0xf]  ;;  %v1077_v24 = vld [vmem:[#allocation2 + $0xd4] sm:$0xf0]  ;;  %v1026_v26 = vor.u32 %v1093_v20, %v1023_v21  ;;  %v1074_v28 = vld [vmem:[#allocation2 + $0xc4] sm:$0xf] }
  0x23   : > { %560 = vmatpush.bf16.msra.mxu0 %v990_v12  ;;  %573 = vmatpush.bf16.msra.mxu1 %v994_v13  ;;  %v997_v29 = vld [vmem:[#allocation2 + $0x128] sm:$0xf]  ;;  %v1090_v30 = vld [vmem:[#allocation2 + $0x13c] sm:$0xf0]  ;;  %v943_v31 = vld [vmem:[#allocation2 + $0xd8] sm:$0xf0]  ;;  %v942_v36 = vor.u32 %v1077_v24, %v941_v23 }
  0x24   : > { %585 = vmatpush.bf16.msra.mxu2 %v1022_v25  ;;  %598 = vmatpush.bf16.msra.mxu3 %v1026_v26  ;;  %v998_v32 = vor.u32 %v1090_v30, %v997_v29  ;;  %v1087_v33 = vld [vmem:[#allocation2 + $0x12c] sm:$0xf]  ;;  %v999_v34 = vld [vmem:[#allocation2 + $0x140] sm:$0xf0]  ;;  %v973_v37 = vld [vmem:[#allocation2 + $0xf8] sm:$0xf]  ;;  %v946_v40 = vor.u32 %v1074_v28, %v943_v31 }
  0x25   : > { %v1002_v35 = vor.u32 %v1087_v33, %v999_v34  ;;  %v1084_v38 = vld [vmem:[#allocation2 + $0x10c] sm:$0xf0]  ;;  %v1081_v39 = vld [vmem:[#allocation2 + $0xfc] sm:$0xf]  ;;  %v1071_v42 = vld [vmem:[#allocation2 + $0xa4] sm:$0xf0] }
  0x26   : > { %v917_v41 = vld [vmem:[#allocation2 + $0x90] sm:$0xf]  ;;  %v975_v43 = vld [vmem:[#allocation2 + $0x110] sm:$0xf0]  ;;  %v919_v45 = vld [vmem:[#allocation2 + $0xa8] sm:$0xf0]  ;;  %v974_v46 = vor.u32 %v1084_v38, %v973_v37 }
  0x27   : > { %561 = vmatpush.bf16.msra.mxu0 %v966_v22  ;;  %574 = vmatpush.bf16.msra.mxu1 %v970_v27  ;;  %v1068_v44 = vld [vmem:[#allocation2 + $0x94] sm:$0xf]  ;;  %v978_v47 = vor.u32 %v1081_v39, %v975_v43  ;;  %v949_v48 = vld [vmem:[#allocation2 + $0xc8] sm:$0xf]  ;;  %v1078_v49 = vld [vmem:[#allocation2 + $0xdc] sm:$0xf0]  ;;  %v918_v52 = vor.u32 %v1071_v42, %v917_v41 }
  0x28   : > { %586 = vmatpush.bf16.msra.mxu2 %v998_v32  ;;  %599 = vmatpush.bf16.msra.mxu3 %v1002_v35  ;;  %v1075_v50 = vld [vmem:[#allocation2 + $0xcc] sm:$0xf]  ;;  %v951_v51 = vld [vmem:[#allocation2 + $0xe0] sm:$0xf0]  ;;  %v922_v53 = vor.u32 %v1068_v44, %v919_v45  ;;  %v893_v54 = vld [vmem:[#allocation2 + $0x60] sm:$0xf]  ;;  %v950_v58 = vor.u32 %v1078_v49, %v949_v48 }
  0x29   : > { %v1065_v55 = vld [vmem:[#allocation2 + $0x74] sm:$0xf0]  ;;  %v1062_v56 = vld [vmem:[#allocation2 + $0x64] sm:$0xf]  ;;  %v895_v57 = vld [vmem:[#allocation2 + $0x78] sm:$0xf0]  ;;  %v954_v59 = vor.u32 %v1075_v50, %v951_v51 }
  0x2a   : > { %v925_v60 = vld [vmem:[#allocation2 + $0x98] sm:$0xf]  ;;  %v1072_v61 = vld [vmem:[#allocation2 + $0xac] sm:$0xf0]  ;;  %v1069_v62 = vld [vmem:[#allocation2 + $0x9c] sm:$0xf]  ;;  %v894_v0 = vor.u32 %v1065_v55, %v893_v54  ;;  %v898_v1 = vor.u32 %v1062_v56, %v895_v57 }
  0x2b   : > { %562 = vmatpush.bf16.msra.mxu0 %v942_v36  ;;  %575 = vmatpush.bf16.msra.mxu1 %v946_v40  ;;  %v927_v63 = vld [vmem:[#allocation2 + $0xb0] sm:$0xf0]  ;;  %v869_v2 = vld [vmem:[#allocation2 + $0x30] sm:$0xf]  ;;  %v1059_v3 = vld [vmem:[#allocation2 + $0x44] sm:$0xf0]  ;;  %v926_v6 = vor.u32 %v1072_v61, %v925_v60 }
  0x2c   : > { %587 = vmatpush.bf16.msra.mxu2 %v974_v46  ;;  %600 = vmatpush.bf16.msra.mxu3 %v978_v47  ;;  %v1056_v4 = vld [vmem:[#allocation2 + $0x34] sm:$0xf]  ;;  %v871_v5 = vld [vmem:[#allocation2 + $0x48] sm:$0xf0]  ;;  %v930_v7 = vor.u32 %v1069_v62, %v927_v63  ;;  %v901_v8 = vld [vmem:[#allocation2 + $0x68] sm:$0xf]  ;;  %v870_v12 = vor.u32 %v1059_v3, %v869_v2 }
  0x2d   : > { %v1066_v9 = vld [vmem:[#allocation2 + $0x7c] sm:$0xf0]  ;;  %v1063_v10 = vld [vmem:[#allocation2 + $0x6c] sm:$0xf]  ;;  %v903_v11 = vld [vmem:[#allocation2 + $0x80] sm:$0xf0]  ;;  %v874_v14 = vor.u32 %v1056_v4, %v871_v5 }
  0x2e   : > { %v845_v13 = vld [vmem:[#allocation2] sm:$0xf]  ;;  %v1053_v15 = vld [vmem:[#allocation2 + $0x14] sm:$0xf0]  ;;  %v1050_v16 = vld [vmem:[#allocation2 + $0x4] sm:$0xf]  ;;  %v902_v21 = vor.u32 %v1066_v9, %v901_v8  ;;  %v906_v22 = vor.u32 %v1063_v10, %v903_v11 }
  0x2f   : > { %563 = vmatpush.bf16.msra.mxu0 %v918_v52  ;;  %576 = vmatpush.bf16.msra.mxu1 %v922_v53  ;;  %v847_v17 = vld [vmem:[#allocation2 + $0x18] sm:$0xf0]  ;;  %v1029_v18 = vld [vmem:[#allocation2 + $0x160] sm:$0xf]  ;;  %v1097_v19 = vld [vmem:[#allocation2 + $0x174] sm:$0xf0]  ;;  %v846_v26 = vor.u32 %v1053_v15, %v845_v13 }
  0x30   : > { %588 = vmatpush.bf16.msra.mxu2 %v950_v58  ;;  %601 = vmatpush.bf16.msra.mxu3 %v954_v59  ;;  %v1094_v20 = vld [vmem:[#allocation2 + $0x164] sm:$0xf]  ;;  %v1031_v23 = vld [vmem:[#allocation2 + $0x178] sm:$0xf0]  ;;  %v877_v24 = vld [vmem:[#allocation2 + $0x38] sm:$0xf]  ;;  %v850_v29 = vor.u32 %v1050_v16, %v847_v17  ;;  %v1030_v30 = vor.u32 %v1097_v19, %v1029_v18  ;;  %v253_v18 = vlaneseq }
  0x31   : > { %v1060_v25 = vld [vmem:[#allocation2 + $0x4c] sm:$0xf0]  ;;  %v1057_v27 = vld [vmem:[#allocation2 + $0x3c] sm:$0xf]  ;;  %v879_v28 = vld [vmem:[#allocation2 + $0x50] sm:$0xf0]  ;;  %v1034_v31 = vor.u32 %v1094_v20, %v1031_v23 }
  0x32   : > { %v1005_v32 = vld [vmem:[#allocation2 + $0x130] sm:$0xf]  ;;  %v1091_v33 = vld [vmem:[#allocation2 + $0x144] sm:$0xf0]  ;;  %v1088_v34 = vld [vmem:[#allocation2 + $0x134] sm:$0xf]  ;;  %v878_v35 = vor.u32 %v1060_v25, %v877_v24  ;;  %v882_v37 = vor.u32 %v1057_v27, %v879_v28 }
  0x33   : > { %564 = vmatpush.bf16.msra.mxu0 %v894_v0  ;;  %577 = vmatpush.bf16.msra.mxu1 %v898_v1  ;;  %v1007_v36 = vld [vmem:[#allocation2 + $0x148] sm:$0xf0]  ;;  %v853_v38 = vld [vmem:[#allocation2 + $0x8] sm:$0xf]  ;;  %v1054_v39 = vld [vmem:[#allocation2 + $0x1c] sm:$0xf0]  ;;  %v1006_v42 = vor.u32 %v1091_v33, %v1005_v32 }
  0x34   : > { %589 = vmatpush.bf16.msra.mxu2 %v926_v6  ;;  %602 = vmatpush.bf16.msra.mxu3 %v930_v7  ;;  %v1051_v40 = vld [vmem:[#allocation2 + $0xc] sm:$0xf]  ;;  %v855_v41 = vld [vmem:[#allocation2 + $0x20] sm:$0xf0]  ;;  %v1010_v43 = vor.u32 %v1088_v34, %v1007_v36  ;;  %v981_v44 = vld [vmem:[#allocation2 + $0x100] sm:$0xf]  ;;  %v854_v46 = vor.u32 %v1054_v39, %v853_v38 }
  0x35   : > { %v1085_v45 = vld [vmem:[#allocation2 + $0x114] sm:$0xf0]  ;;  %v1082_v47 = vld [vmem:[#allocation2 + $0x104] sm:$0xf]  ;;  %v983_v48 = vld [vmem:[#allocation2 + $0x118] sm:$0xf0]  ;;  %v858_v49 = vor.u32 %v1051_v40, %v855_v41 }
  0x36   : > { %v982_v50 = vor.u32 %v1085_v45, %v981_v44  ;;  %v986_v51 = vor.u32 %v1082_v47, %v983_v48  ;;  %v957_v52 = vld [vmem:[#allocation2 + $0xd0] sm:$0xf]  ;;  %v1079_v53 = vld [vmem:[#allocation2 + $0xe4] sm:$0xf0]  ;;  %v1076_v54 = vld [vmem:[#allocation2 + $0xd4] sm:$0xf] }
  0x37   : > { %565 = vmatpush.bf16.msra.mxu0 %v870_v12  ;;  %578 = vmatpush.bf16.msra.mxu1 %v874_v14  ;;  %v959_v55 = vld [vmem:[#allocation2 + $0xe8] sm:$0xf0]  ;;  %v958_v56 = vor.u32 %v1079_v53, %v957_v52  ;;  %v933_v58 = vld [vmem:[#allocation2 + $0xa0] sm:$0xf]  ;;  %v1073_v59 = vld [vmem:[#allocation2 + $0xb4] sm:$0xf0] }
  0x38   : > { %590 = vmatpush.bf16.msra.mxu2 %v902_v21  ;;  %603 = vmatpush.bf16.msra.mxu3 %v906_v22  ;;  %v962_v57 = vor.u32 %v1076_v54, %v959_v55  ;;  %v934_v60 = vor.u32 %v1073_v59, %v933_v58  ;;  %v1070_v61 = vld [vmem:[#allocation2 + $0xa4] sm:$0xf]  ;;  %v935_v62 = vld [vmem:[#allocation2 + $0xb8] sm:$0xf0]  ;;  %v909_v0 = vld [vmem:[#allocation2 + $0x70] sm:$0xf] }
  0x39   : > { %v938_v63 = vor.u32 %v1070_v61, %v935_v62  ;;  %v1067_v1 = vld [vmem:[#allocation2 + $0x84] sm:$0xf0]  ;;  %v1064_v2 = vld [vmem:[#allocation2 + $0x74] sm:$0xf]  ;;  %v911_v4 = vld [vmem:[#allocation2 + $0x88] sm:$0xf0] }
  0x3a   : > { %v910_v3 = vor.u32 %v1067_v1, %v909_v0  ;;  %v914_v5 = vor.u32 %v1064_v2, %v911_v4  ;;  %v885_v6 = vld [vmem:[#allocation2 + $0x40] sm:$0xf]  ;;  %v1061_v7 = vld [vmem:[#allocation2 + $0x54] sm:$0xf0]  ;;  %v1058_v8 = vld [vmem:[#allocation2 + $0x44] sm:$0xf] }
  0x3b   : > { %566 = vmatpush.bf16.msra.mxu0 %v846_v26  ;;  %579 = vmatpush.bf16.msra.mxu1 %v850_v29  ;;  %v887_v9 = vld [vmem:[#allocation2 + $0x58] sm:$0xf0]  ;;  %v886_v10 = vor.u32 %v1061_v7, %v885_v6  ;;  %v861_v12 = vld [vmem:[#allocation2 + $0x10] sm:$0xf]  ;;  %v1055_v13 = vld [vmem:[#allocation2 + $0x24] sm:$0xf0] }
  0x3c   : > { %591 = vmatpush.bf16.msra.mxu2 %v878_v35  ;;  %604 = vmatpush.bf16.msra.mxu3 %v882_v37  ;;  %v890_v11 = vor.u32 %v1058_v8, %v887_v9  ;;  %v1052_v14 = vld [vmem:[#allocation2 + $0x14] sm:$0xf]  ;;  %v863_v15 = vld [vmem:[#allocation2 + $0x28] sm:$0xf0]  ;;  %v862_v16 = vor.u32 %v1055_v13, %v861_v12  ;;  %v254_v19 = vand.u32 127, %v253_v18  ;;  %v310_v22 = vld [vmem:[#allocation5] sm:$0xff] }
  0x3d   : > { %v866_v17 = vor.u32 %v1052_v14, %v863_v15  ;;  %v1307_v21 = vmov 1.0|1.0   ;;  %v311_v25 = vld [vmem:[#allocation5 + $0x8] sm:$0xff]  ;;  %v313_v26 = vunpack.c.l.bf16 %v310_v22  ;;  %v314_v27 = vunpack.c.h.bf16 %v310_v22  ;;  %v312_v36 = vld [vmem:[#allocation5 + $0x10] sm:$0xff]  ;;  %v637_v22 = vld [vmem:[%s1465_s3] sm:$0x3f] }
  0x3e   : > { %v315_v28 = vunpack.c.l.bf16 %v311_v25  ;;  %v316_v38 = vunpack.c.h.bf16 %v311_v25  ;;  %v317_v40 = vunpack.c.l.bf16 %v312_v36  ;;  %v318_v44 = vunpack.c.h.bf16 %v312_v36  ;;  %v638_v25 = vld [vmem:[%s1466_s4] sm:$0x3f]  ;;  %s1099_s13 = smul.u32 24, %s1360_s22  ;;  %s247_s16 = scalar_lea.vmem [#allocation7], %s1426_s12 }
  0x3f   : > { %611 = vmatpush.bf16.msrb.mxu0 %v1030_v30  ;;  %624 = vmatpush.bf16.msrb.mxu1 %v1034_v31  ;;  %v1308_v54 = vmov 768.0   ;;  %v713_v36 = vperm.slane %v638_v25, 2  ;;  %s749_s17 = sshll.u32 %s247_s16, 4  ;;  %s736_s25 = scalar_lea.sflag [#allocation4], %s245_s9  ;;  %s750_s17 = int_to_ptr.vmem [resolvable:$true] %s749_s17 }
  0x40   : > { %592 = vmatpush.bf16.msra.mxu2 %v854_v46  ;;  %605 = vmatpush.bf16.msra.mxu3 %v858_v49  ;;  %1166 = vrcp.f32 %v1308_v54  ;;  %s747_s22 = scalar_lea.hbm %s1467_s5, %s1099_s13  ;;  %s1250_s8 = scalar_lea.hbm %s1467_s5, 48 }
  0x41   : > { %s751_s23 = sshll.u32 %s747_s22, 4  ;;  %s752_s23 = int_to_ptr.hbm [resolvable:$true] %s751_s23 }
  0x42   : > { %s1244_s26 = sshra.s32 %s752_s23, 4  ;;  %s1245_s26 = int_to_ptr.hbm [resolvable:$true] %s1244_s26 }
  0x43   : > { %612 = vmatpush.bf16.msrb.mxu0 %v1006_v42  ;;  %625 = vmatpush.bf16.msrb.mxu1 %v1010_v43  ;;  %s1246_s30 = scalar_lea.hbm %s1245_s26, 24  ;;  %p1251_p3 = scmp.lt.s32.totalorder %s1245_s26, %s1467_s5 }
  0x44   : > { %p1247_p0 = scmp.ne.s32.totalorder %s1245_s26, %s1246_s30  ;;  %p1252_p4 = scmp.lt.s32.totalorder %s1250_s8, %s1246_s30 }
  0x46   : > { %v1167_v55 = vpop.eup %1166  ;;  %p1248_p1 = pnand %p1247_p0, %p1377_p5  ;;  %p1253_p7 = por %p1252_p4, %p1251_p3 }
  0x47   : > { %613 = vmatpush.bf16.msrb.mxu0 %v982_v50  ;;  %626 = vmatpush.bf16.msrb.mxu1 %v986_v51  ;;  %vm651_vm2 = vweird.f32 %v1167_v55 }
  0x48   : > { %p1249_p2 = pneg %p1248_p1 }
  0x4a   : > { %p1254_p8 = pnand %p1253_p7, %p1249_p2 }
  0x4b   : > { %614 = vmatpush.bf16.msrb.mxu0 %v958_v56  ;;  %627 = vmatpush.bf16.msrb.mxu1 %v962_v57  ;;  %v647_v56 = vmul.f32 768.0, %v1167_v55 }
  0x4d   : > { %v648_v57 = vsub.f32 1.0, %v647_v56 }
  0x4f   : > { %615 = vmatpush.bf16.msrb.mxu0 %v934_v60  ;;  %628 = vmatpush.bf16.msrb.mxu1 %v938_v63  ;;  %v649_v58 = vmul.f32 %v1167_v55, %v648_v57 }
  0x51   : > { %v650_v59 = vadd.f32 %v1167_v55, %v649_v58 }
  0x53   : > { %616 = vmatpush.bf16.msrb.mxu0 %v910_v3  ;;  %629 = vmatpush.bf16.msrb.mxu1 %v914_v5  ;;  %v652_v60 = vsel %vm651_vm2, %v1167_v55, %v650_v59 }
  0x57   : > { %617 = vmatpush.bf16.msrb.mxu0 %v886_v10  ;;  %630 = vmatpush.bf16.msrb.mxu1 %v890_v11 }
  0x5b   : > { %618 = vmatpush.bf16.msrb.mxu0 %v862_v16  ;;  %631 = vmatpush.bf16.msrb.mxu1 %v866_v17 }
  0x94   : > { %v257_v20 = vpop.permute.xlu0 %256 }
  0x95   : > { %vm258_vm0 = vcmp.eq.s32.totalorder %v257_v20, %v254_v19 }
  0x96   : > { %vm1035_vm1 = vmpackc.low %vm258_vm0, %vm258_vm0 }
  0x97   : > { %1036 = vmatmul.msk.bf16.vlgmr.msra.gmra.mxu0 %vm1035_vm1, %v1307_v21  ;;  %1038 = vmatmul.msk.bf16.vlgmr.msra.gmra.mxu1 %vm1035_vm1, %v1307_v21 }
  0x98   : > { %1040 = vmatmul.msk.bf16.vlgmr.msra.gmra.mxu2 %vm1035_vm1, %v1307_v21  ;;  %1042 = vmatmul.msk.bf16.vlgmr.msra.gmra.mxu3 %vm1035_vm1, %v1307_v21 }
  0xa7   : > { %1044 = vmatmul.msk.bf16.vlgmr.msrb.gmra.mxu0 %vm1035_vm1, %v1307_v21  ;;  %1046 = vmatmul.msk.bf16.vlgmr.msrb.gmra.mxu1 %vm1035_vm1, %v1307_v21 }
 0x114   : > { %v568_v23 = vpop.f32.mrf.mxu0  ;;  %v581_v24 = vpop.f32.mrf.mxu1 }
 0x115   : > { %v569_v29 = vadd.f32 %v568_v23, %v313_v26  ;;  %v582_v30 = vadd.f32 %v581_v24, %v314_v27  ;;  %v692_v26 = vperm.slane %v637_v22, 0  ;;  %v693_v27 = vperm.slane %v637_v22, 1 }
 0x117   : > { %v639_v37 = vadd.f32 %v582_v30, %v569_v29 }
 0x11b   : > { %v594_v31 = vpop.f32.mrf.mxu2  ;;  %v607_v32 = vpop.f32.mrf.mxu3 }
 0x11c   : > { %v570_v33 = vpop.f32.mrf.mxu0  ;;  %v583_v34 = vpop.f32.mrf.mxu1  ;;  %v595_v35 = vadd.f32 %v594_v31, %v315_v28  ;;  %v608_v41 = vadd.f32 %v607_v32, %v316_v38  ;;  %v694_v28 = vperm.slane %v637_v22, 2  ;;  %v696_v31 = vperm.slane %v637_v22, 4 }
 0x11d   : > { %v697_v32 = vperm.slane %v637_v22, 5  ;;  %v711_v33 = vperm.slane %v638_v25, 0 }
 0x11e   : > { %v640_v39 = vadd.f32 %v639_v37, %v595_v35  ;;  %v714_v37 = vperm.slane %v638_v25, 3 }
 0x120   : > { %v641_v47 = vadd.f32 %v640_v39, %v608_v41 }
 0x123   : > { %v596_v42 = vpop.f32.mrf.mxu2  ;;  %v609_v43 = vpop.f32.mrf.mxu3 }
 0x124   : > { %v620_v45 = vpop.f32.mrf.mxu0  ;;  %v633_v46 = vpop.f32.mrf.mxu1 }
 0x125   : > { %v621_v48 = vadd.f32 %v620_v45, %v317_v40  ;;  %v634_v50 = vadd.f32 %v633_v46, %v318_v44  ;;  %v715_v44 = vperm.slane %v638_v25, 4  ;;  %v716_v45 = vperm.slane %v638_v25, 5 }
 0x127   : > { %v642_v49 = vadd.f32 %v641_v47, %v621_v48 }
 0x129   : > { %v643_v51 = vadd.f32 %v642_v49, %v634_v50 }
 0x12b   : > { %644 = vadd.xlane.f32.xlu0 %v643_v51 }
 0x12c   : > { %v622_v52 = vpop.f32.mrf.mxu0  ;;  %v635_v53 = vpop.f32.mrf.mxu1 }
 0x19e   : > { %v645_v61 = vpop.xlane.xlu0 %644 }
 0x19f   : > { %v653_v62 = vmul.f32 %v652_v60, %v645_v61 }
 0x1a1   : > { %v654_v63 = vsub.f32 %v569_v29, %v653_v62  ;;  %v655_v0 = vsub.f32 %v582_v30, %v653_v62  ;;  %v656_v1 = vsub.f32 %v595_v35, %v653_v62  ;;  %v657_v2 = vsub.f32 %v608_v41, %v653_v62 }
 0x1a2   : > { %v658_v5 = vsub.f32 %v621_v48, %v653_v62  ;;  %v659_v8 = vsub.f32 %v634_v50, %v653_v62  ;;  %v695_v30 = vperm.slane %v637_v22, 3  ;;  %v712_v35 = vperm.slane %v638_v25, 1 }
 0x1a3   : > { %v660_v3 = vmul.f32 %v654_v63, %v654_v63  ;;  %v661_v4 = vmul.f32 %v655_v0, %v655_v0  ;;  %v662_v6 = vmul.f32 %v656_v1, %v656_v1  ;;  %v663_v9 = vmul.f32 %v657_v2, %v657_v2 }
 0x1a4   : > { %v664_v11 = vmul.f32 %v658_v5, %v658_v5  ;;  %v665_v13 = vmul.f32 %v659_v8, %v659_v8 }
 0x1a5   : > { %v666_v7 = vadd.f32 %v661_v4, %v660_v3 }
 0x1a7   : > { %v667_v10 = vadd.f32 %v666_v7, %v662_v6 }
 0x1a9   : > { %v668_v12 = vadd.f32 %v667_v10, %v663_v9 }
 0x1ab   : > { %v669_v14 = vadd.f32 %v668_v12, %v664_v11 }
 0x1ad   : > { %v670_v15 = vadd.f32 %v669_v14, %v665_v13 }
 0x1af   : > { %671 = vadd.xlane.f32.xlu1 %v670_v15 }
 0x222   : > { %v672_v16 = vpop.xlane.xlu1 %671 }
 0x223   : > { %v673_v17 = vmul.f32 %v672_v16, %v652_v60 }
 0x225   : > { %v674_v18 = vadd.f32 1e-12, %v673_v17 }
 0x227   : > { %1168 = vrsqrt.f32 %v674_v18  ;;  %vm681_vm4 = vweird.f32 %v674_v18 }
 0x22d   : > { %v1169_v19 = vpop.eup %1168 }
 0x22e   : > { %v676_v20 = vmul.f32 %v1169_v19, %v674_v18  ;;  %vm682_vm3 = vweird.f32 %v1169_v19 }
 0x22f   : > { %vm683_vm5 = vmor %vm681_vm4, %vm682_vm3 }
 0x230   : > { %v677_v21 = vmul.f32 %v1169_v19, %v676_v20 }
 0x232   : > { %v678_v23 = vmul.f32 0.5, %v677_v21 }
 0x234   : > { %v679_v24 = vsub.f32 1.5, %v678_v23 }
 0x236   : > { %v680_v29 = vmul.f32 %v1169_v19, %v679_v24 }
 0x238   : > { %v684_v34 = vsel %vm683_vm5, %v1169_v19, %v680_v29 }
 0x239   : > { %v685_v38 = vmul.f32 %v684_v34, %v654_v63  ;;  %v686_v39 = vmul.f32 %v684_v34, %v655_v0  ;;  %v687_v40 = vmul.f32 %v684_v34, %v656_v1  ;;  %v688_v41 = vmul.f32 %v684_v34, %v657_v2 }
 0x23a   : > { %v689_v42 = vmul.f32 %v684_v34, %v658_v5  ;;  %v690_v43 = vmul.f32 %v684_v34, %v659_v8 }
 0x23b   : > { %v704_v46 = vmul.f32 %v692_v26, %v685_v38  ;;  %v705_v47 = vmul.f32 %v693_v27, %v686_v39  ;;  %v706_v48 = vmul.f32 %v694_v28, %v687_v40  ;;  %v707_v49 = vmul.f32 %v695_v30, %v688_v41 }
 0x23c   : > { %v708_v50 = vmul.f32 %v696_v31, %v689_v42  ;;  %v709_v51 = vmul.f32 %v697_v32, %v690_v43 }
 0x23d   : > { %v723_v52 = vadd.f32 %v711_v33, %v704_v46  ;;  %v724_v53 = vadd.f32 %v712_v35, %v705_v47  ;;  %v725_v54 = vadd.f32 %v713_v36, %v706_v48  ;;  %v726_v55 = vadd.f32 %v714_v37, %v707_v49 }
 0x23e   : > { %v727_v56 = vadd.f32 %v715_v44, %v708_v50  ;;  %v728_v57 = vadd.f32 %v716_v45, %v709_v51 }
 0x23f   : > { %v729_v58 = vpack.c.bf16 %v724_v53, %v723_v52  ;;  %v730_v59 = vpack.c.bf16 %v726_v55, %v725_v54 }
 0x240   : > { %v731_v60 = vpack.c.bf16 %v728_v57, %v727_v56 }
 0x241   : > { %732 = vst [vmem:[%s247_s16] sm:$0xff] %v729_v58 }
 0x242   : > { %733 = vst [vmem:[%s247_s16 + $0x8] sm:$0xff] %v730_v59 }
 0x243   : > { %734 = vst [vmem:[%s247_s16 + $0x10] sm:$0xff] %v731_v60 }
 0x244   : > { %1257 = shalt.err (!%p1254_p8)
}
 0x245   : > { %1108 = dma.vmem_to_hbm [thread:$0]  (%p1377_p5), %s750_s17, 384, %s752_s23, %s736_s25  }
 0x246 PF: > { %p1125_p9 = scmp.ge.s32.totalorder %s1300_s21, 2  ;;  %s763_s9 = sand.u32 1, %s1288_s18  }
 0x247   : > { %s764_s12 = scalar_lea.sflag [#allocation4], %s763_s9 }
 0x248   : > { %p1118_p10 = pnand %p1125_p9, %p1381_p6 }
 0x24a   : > { %p1119_p11 = pneg %p1118_p10 }
 0x24c   : > { %1283 = dma.done.wait (%p1119_p11), %s764_s12, 384  }
 0x24d   : > { %1285 = vsyncadd (%p1119_p11), %s764_s12, 4294966912  ;;  %p17_p12 = scmp.ge.s32.totalorder %s1364_s24, 4   ;;  %s1471_s18 = smov %s1292_s19 }
 0x24e   : > { %s1472_s19 = smov %s1296_s20  ;;  %s1473_s20 = smov %s1375_s27 }
 0x24f   : > { %s1474_s21 = smov %s1364_s24  ;;  %19 = sbr.rel (!%p17_p12) target bundleno = 5 (0x5), region = 84 }
 0x254   :  { %770 = vsyncpa [#allocation3], 1 }
 0x255   :  { %772 = vsyncpa [#allocation3 + $0x1], 1 }
 0x256   :  { %773 = vsyncpa [#allocation6], 1 }
 0x257   :  { %774 = vsyncpa [#allocation4], 1 }
 0x258   :  { %776 = vsyncpa [#allocation4 + $0x1], 1 }

</bundles_post_ra>
